<compile_context>
chip_gen: v7x
topology: tpu7x:2x2x1
jax: 0.10.0
libtpu: 0.0.40
codegen_flags: <defaults>
</compile_context>

<pallas_src>
import functools
import math

import jax
import jax.numpy as jnp
from jax.experimental import pallas as pl
from jax.experimental.pallas import tpu as pltpu


def _rmsnorm_kernel(x_ref, w_ref, o_ref, *, eps, inv_hidden):
    # Upcast to fp32 (matches `hidden_states.to(torch.float32)`).
    x = x_ref[...].astype(jnp.float32)
    # variance = mean(x^2, -1, keepdim) computed as sum * (1/hidden): the
    # constant multiply keeps a vector divide off the VALU path.
    var = jnp.sum(x * x, axis=-1, keepdims=True) * inv_hidden
    normed = x * jax.lax.rsqrt(var + eps)
    # Downcast BEFORE the weight multiply to match PyTorch rounding exactly
    # (`self.weight * hidden_states.to(input_dtype)`), including the dtype
    # promotion coming from the weight.
    out = w_ref[...] * normed.astype(x_ref.dtype)
    o_ref[...] = out.astype(o_ref.dtype)


def _round_up(x, m):
    return ((x + m - 1) // m) * m


def _sublane_multiple(dtype) -> int:
    """Rows per packed vreg sublane group: f32 -> 8, bf16 -> 16, int8 -> 32."""
    itemsize = jnp.dtype(dtype).itemsize
    return 8 * max(1, 4 // max(1, itemsize))


def _default_vmem_sizes():
    """(budget_bytes, scoped_limit_bytes), generation-aware."""
    try:
        info = pltpu.get_tpu_info()
        cap = getattr(info, "vmem_capacity_bytes", None)
        if cap is not None and cap >= 128 * 1024 * 1024:
            # v5e / v6e class parts: 128 MiB physical VMEM.
            return 64 * 1024 * 1024, 100 * 1024 * 1024
    except Exception:
        pass
    # v7x (64 MiB physical VMEM) or unknown: stay conservative.
    return 32 * 1024 * 1024, 44 * 1024 * 1024


def _pick_row_tile(rows, hidden, in_dtype, out_dtype, vmem_budget_bytes,
                   target_tile_bytes=8 * 1024 * 1024,
                   min_grid_steps=8,
                   min_tile_bytes=2 * 1024 * 1024):
    """Largest row tile (multiple of the sublane packing) fitting the budget,
    sized by bytes and capped to leave enough grid steps for megacore."""
    in_b = jnp.dtype(in_dtype).itemsize
    out_b = jnp.dtype(out_dtype).itemsize
    pack = _sublane_multiple(in_dtype)

    # Per-row VMEM estimate: double-buffered input + output tiles plus ~2
    # fp32-tile-sized elementwise temporaries (single-buffered scratch).
    per_row_vmem = hidden * (2 * in_b + 2 * out_b + 2 * 4)
    fit = max(1, vmem_budget_bytes // max(1, per_row_vmem))

    # Size the tile by bytes of input streamed per grid step (~8 MiB target).
    target_rows = max(pack, target_tile_bytes // max(1, hidden * in_b))

    tile = min(target_rows, fit, rows)

    # Keep >= min_grid_steps grid steps (megacore sharding on v7x), but never
    # shrink tiles below ~2 MiB of input (that is where the roofline flattens).
    if rows > tile and tile >= pack:
        steps_cap = _round_up(pl.cdiv(rows, min_grid_steps), pack)
        floor_rows = max(pack, min_tile_bytes // max(1, hidden * in_b))
        tile = min(tile, max(steps_cap, floor_rows))

    if tile >= pack:
        tile = (tile // pack) * pack
    elif rows >= pack:
        # Do not fall back to one giant block; a single packed group always
        # fits comfortably in VMEM.
        tile = pack
    else:
        # Tiny problem: single full block (allowed: block dim == array dim).
        tile = rows
    return max(1, tile)


def mla_rmsnorm(hidden_states, weight, eps=1e-6, *, row_tile=None,
                vmem_budget_bytes=None, out_dtype=None):
    """RMSNorm over the last axis of `hidden_states`, scaled by `weight`.

    `out_dtype=None` reproduces PyTorch's promotion (weight dtype * input
    dtype).  Pass e.g. `out_dtype=hidden_states.dtype` to avoid the f32
    output promotion when the caller casts back anyway (halves write traffic).
    """
    orig_shape = hidden_states.shape
    hidden = orig_shape[-1]
    rows = int(math.prod(orig_shape[:-1])) if len(orig_shape) > 1 else 1

    x2d = hidden_states.reshape(rows, hidden)
    w2d = weight.reshape(1, hidden)

    # PyTorch promotion: weight(dtype) * hidden_states(input_dtype)
    if out_dtype is None:
        out_dtype = jnp.promote_types(weight.dtype, hidden_states.dtype)

    budget_default, limit_default = _default_vmem_sizes()
    if vmem_budget_bytes is None:
        vmem_budget_bytes = budget_default
        vmem_limit = limit_default
    else:
        vmem_limit = int(min(limit_default,
                             max(16 * 1024 * 1024,
                                 int(1.5 * vmem_budget_bytes))))

    if row_tile is None:
        row_tile = _pick_row_tile(rows, hidden, hidden_states.dtype, out_dtype,
                                  vmem_budget_bytes)
    row_tile = max(1, min(row_tile, rows))

    grid = (pl.cdiv(rows, row_tile),)

    out2d = pl.pallas_call(
        functools.partial(_rmsnorm_kernel, eps=eps, inv_hidden=1.0 / hidden),
        out_shape=jax.ShapeDtypeStruct((rows, hidden), out_dtype),
        grid_spec=pltpu.PrefetchScalarGridSpec(
            num_scalar_prefetch=0,
            grid=grid,
            in_specs=[
                pl.BlockSpec((row_tile, hidden), lambda i: (i, 0)),
                pl.BlockSpec((1, hidden), lambda i: (0, 0)),
            ],
            out_specs=pl.BlockSpec((row_tile, hidden), lambda i: (i, 0)),
        ),
        compiler_params=pltpu.CompilerParams(
            dimension_semantics=("parallel",),
            vmem_limit_bytes=int(vmem_limit),
        ),
    )(x2d, w2d)

    return out2d.reshape(orig_shape[:-1] + (hidden,))


def mla_rmsnorm_ref(hidden_states, weight, eps=1e-6):
    """Pure-JAX reference mirroring the PyTorch forward."""
    input_dtype = hidden_states.dtype
    x = hidden_states.astype(jnp.float32)
    var = jnp.mean(x * x, axis=-1, keepdims=True)
    x = x * jax.lax.rsqrt(var + eps)
    return weight * x.astype(input_dtype)


if __name__ == "__main__":
    # Small shapes consistent with the module: (batch, seq, hidden)
    batch, seq, hidden = 2, 8, 128
    key = jax.random.PRNGKey(0)
    eps = 1e-6

    # Deterministic parameter init: nn.Parameter(torch.ones(hidden_size))
    weight = jnp.ones((hidden,), dtype=jnp.float32)

    # f32 input
    x_f32 = jax.random.normal(key, (batch, seq, hidden), dtype=jnp.float32)
    out = jax.block_until_ready(mla_rmsnorm(x_f32, weight, eps))
    ref = mla_rmsnorm_ref(x_f32, weight, eps)
    assert out.shape == ref.shape and out.dtype == ref.dtype
    assert jnp.allclose(out, ref, atol=1e-5, rtol=1e-5)

    # bf16 input (exercises the PyTorch-matching downcast + promotion path)
    x_bf16 = x_f32.astype(jnp.bfloat16)
    out_bf = jax.block_until_ready(mla_rmsnorm(x_bf16, weight, eps))
    ref_bf = mla_rmsnorm_ref(x_bf16, weight, eps)
    assert out_bf.shape == ref_bf.shape and out_bf.dtype == ref_bf.dtype
    assert jnp.allclose(out_bf, ref_bf, atol=2e-2, rtol=2e-2)

    # bf16 input with bf16 output override (bandwidth-saving path) — checked
    # against the reference downcast to bf16.
    out_bf16_out = jax.block_until_ready(
        mla_rmsnorm(x_bf16, weight, eps, out_dtype=jnp.bfloat16))
    assert out_bf16_out.dtype == jnp.bfloat16
    assert jnp.allclose(out_bf16_out.astype(jnp.float32),
                        ref_bf.astype(jnp.float32), atol=3e-2, rtol=3e-2)

    # Rows not a multiple of the tile (partial last block path).
    x_odd = jax.random.normal(jax.random.PRNGKey(1), (3, 5, hidden),
                              dtype=jnp.float32)
    out_odd = jax.block_until_ready(mla_rmsnorm(x_odd, weight, eps, row_tile=8))
    ref_odd = mla_rmsnorm_ref(x_odd, weight, eps)
    assert jnp.allclose(out_odd, ref_odd, atol=1e-5, rtol=1e-5)

    print("KERNEL_OK")
</pallas_src>

<mosaic_0001>
module attributes {stable_mosaic.version = 11 : i64} {
  func.func @_rmsnorm_kernel(%arg0: i32, %arg1: memref<16x128xf32, #tpu.memory_space<vmem>>, %arg2: memref<1x128xf32, #tpu.memory_space<vmem>>, %arg3: memref<16x128xf32, #tpu.memory_space<vmem>>) attributes {dimension_semantics = [#tpu.dimension_semantics<parallel>], iteration_bounds = array<i64: 1>, scalar_prefetch = 0 : i64, scratch_operands = 0 : i64, tpu.core_type = #tpu.core_type<tc>, window_params = [{transform_indices = @transform_0, window_bounds = array<i64: 16, 128>}, {pipeline_mode = #tpu.pipeline_mode<synchronous>, transform_indices = @transform_1, window_bounds = array<i64: 1, 128>}, {transform_indices = @transform_2, window_bounds = array<i64: 16, 128>}]} {
    %c0 = arith.constant 0 : index
    %c0_0 = arith.constant 0 : index
    %0 = vector.load %arg1[%c0, %c0_0] : memref<16x128xf32, #tpu.memory_space<vmem>>, vector<16x128xf32>
    %1 = arith.mulf %0, %0 : vector<16x128xf32>
    %cst = arith.constant dense<0.000000e+00> : vector<16xf32>
    %2 = vector.multi_reduction <add>, %1, %cst [1] : vector<16x128xf32> to vector<16xf32>
    %3 = vector.shape_cast %2 : vector<16xf32> to vector<16x1xf32>
    %cst_1 = arith.constant 7.812500e-03 : f32
    %4 = vector.broadcast %cst_1 : f32 to vector<16x1xf32>
    %5 = arith.mulf %3, %4 : vector<16x1xf32>
    %cst_2 = arith.constant 9.99999997E-7 : f32
    %6 = vector.broadcast %cst_2 : f32 to vector<16x1xf32>
    %7 = arith.addf %5, %6 : vector<16x1xf32>
    %8 = math.rsqrt %7 : vector<16x1xf32>
    %9 = vector.broadcast %8 : vector<16x1xf32> to vector<16x128xf32>
    %10 = arith.mulf %0, %9 : vector<16x128xf32>
    %c0_3 = arith.constant 0 : index
    %c0_4 = arith.constant 0 : index
    %11 = vector.load %arg2[%c0_3, %c0_4] : memref<1x128xf32, #tpu.memory_space<vmem>>, vector<1x128xf32>
    %12 = vector.broadcast %11 : vector<1x128xf32> to vector<16x128xf32>
    %13 = arith.mulf %12, %10 : vector<16x128xf32>
    %c0_5 = arith.constant 0 : index
    %c0_6 = arith.constant 0 : index
    %14 = vector.load %arg3[%c0_5, %c0_6] : memref<16x128xf32, #tpu.memory_space<vmem>>, vector<16x128xf32>
    tpu.vector_store %arg3[%c0_5, %c0_6], %13 {strides = array<i32>} : memref<16x128xf32, #tpu.memory_space<vmem>>, vector<16x128xf32>,
    return
  }
  func.func @transform_0(%arg0: i32) -> (i32, i32) {
    %c0_i32 = arith.constant 0 : i32
    %c0_i32_0 = arith.constant 0 : i32
    return %arg0, %c0_i32 : i32, i32
  }
  func.func @transform_1(%arg0: i32) -> (i32, i32) {
    %c0_i32 = arith.constant 0 : i32
    %c0_i32_0 = arith.constant 0 : i32
    %c0_i32_1 = arith.constant 0 : i32
    return %c0_i32, %c0_i32_0 : i32, i32
  }
  func.func @transform_2(%arg0: i32) -> (i32, i32) {
    %c0_i32 = arith.constant 0 : i32
    %c0_i32_0 = arith.constant 0 : i32
    return %arg0, %c0_i32 : i32, i32
  }
}

</mosaic_0001>

<bundles_post_ra>
// kernel: tpu_custom_call.1
= control target key start
LH: loop header
LB: loop body
LE: loop exit
PB: predicated region body
PF: predicated region fallthrough
CT: control target
= control target key end

     0   :  { %7 = vsyncpa [#allocation3], 0  ;;  %s179_s0 = inlined_call_operand.hbm [shape: f32[16,128], index: 0, kind: input, shape index: {}]   ;;  %s180_s1 = inlined_call_operand.vmem [shape: f32[1,128], index: 1, kind: input, shape index: {}]   ;;  %s181_s2 = inlined_call_operand.hbm [shape: f32[16,128], index: 2, kind: output, shape index: {}]  }
   0x1   :  { %8 = vsyncpa [#allocation4], 0  ;;  %s127_s9 = smov [#allocation2]   ;;  %s79_s13 = scalar_lea.hbm %s179_s0, 256 }
   0x2   :  { %s14_s10 = sshll.u32 %s127_s9, 4  ;;  %p80_p0 = scmp.ne.s32.totalorder %s179_s0, %s79_s13  ;;  %s15_s10 = int_to_ptr.vmem [resolvable:$true] %s14_s10 }
   0x3   :  { %p83_p1 = scmp.lt.u32.totalorder %s79_s13, %s179_s0 }
   0x5   :  { %p85_p2 = pnand %p83_p1, %p80_p0 }
   0x7   :  { %88 = shalt.err (!%p85_p2)
}
   0x8   :  { %s89_s18 = scalar_lea.vmem %s15_s10, 256  ;;  %p94_p4 = scmp.lt.s32.totalorder %s15_s10, %s15_s10 }
   0x9   :  { %p90_p3 = scmp.ne.s32.totalorder %s15_s10, %s89_s18  ;;  %p95_p5 = scmp.lt.s32.totalorder %s89_s18, %s89_s18 }
   0xb   :  { %p96_p6 = por %p95_p5, %p94_p4 }
   0xd   :  { %p97_p7 = pnand %p96_p6, %p90_p3 }
   0xf   :  { %100 = shalt.err (!%p97_p7)
}
  0x10   :  { %s128_s19 = smov 128   ;;  %s129_s20 = smov 8  }
  0x11   :  { %20 = dma.hbm_to_vmem [thread:$0]  %s179_s0, 256, %s15_s10, [#allocation3], %s128_s19, %s128_s19, %s129_s20  }
  0x12   :  { %123 = dma.done.wait [#allocation3], 256  }
  0x13   :  { %124 = vsyncadd [#allocation3], 4294967040  ;;  %v26_v0 = vld [vmem:[#allocation2] sm:$0xff]  ;;  %v27_v1 = vld [vmem:[#allocation2 + $0x8] sm:$0xff]  ;;  %s130_s0 = smov [#allocation5]  }
  0x14   :  { %v28_v2 = vmul.f32 %v26_v0, %v26_v0  ;;  %v29_v3 = vmul.f32 %v27_v1, %v27_v1  ;;  %v70_v11 = vld [vmem:[%s180_s1] ss:$0 sm:$0xff]  ;;  %s58_s25 = sshll.u32 %s130_s0, 4  ;;  %s59_s25 = int_to_ptr.vmem [resolvable:$true] %s58_s25 }
  0x15   :  { %s101_s26 = scalar_lea.vmem %s59_s25, 256  ;;  %p106_p9 = scmp.lt.s32.totalorder %s59_s25, %s59_s25 }
  0x16   :  { %30 = vadd.xlane.f32.xlu0 %v28_v2  ;;  %p102_p8 = scmp.ne.s32.totalorder %s59_s25, %s101_s26  ;;  %p107_p10 = scmp.lt.s32.totalorder %s101_s26, %s101_s26 }
  0x18   :  { %p108_p11 = por %p107_p10, %p106_p9 }
  0x1a   :  { %32 = vadd.xlane.f32.xlu0 %v29_v3  ;;  %p109_p12 = pnand %p108_p11, %p102_p8 }
  0xa3   :  { %v31_v4 = vpop.xlane.xlu0 %30 }
  0xa4   :  { %v34_v5 = vmul.f32 0.0078125, %v31_v4 }
  0xa6   :  { %v36_v6 = vadd.f32 1e-06, %v34_v5 }
  0xa7   :  { %v33_v7 = vpop.xlane.xlu0 %32 }
  0xa8   :  { %75 = vrsqrt.f32 %v36_v6  ;;  %v35_v8 = vmul.f32 0.0078125, %v33_v7 }
  0xaa   :  { %v37_v9 = vadd.f32 1e-06, %v35_v8 }
  0xac   :  { %77 = vrsqrt.f32 %v37_v9 }
  0xb2   :  { %v76_v10 = vpop.eup %75 }
  0xb3   :  { %v40_v12 = vmul.f32 %v76_v10, %v26_v0 }
  0xb5   :  { %v49_v13 = vmul.f32 %v70_v11, %v40_v12 }
  0xb6   :  { %v78_v14 = vpop.eup %77 }
  0xb7   :  { %v41_v15 = vmul.f32 %v78_v14, %v27_v1  ;;  %51 = vst [vmem:[#allocation5] sm:$0xff] %v49_v13 }
  0xb9   :  { %v50_v16 = vmul.f32 %v70_v11, %v41_v15 }
  0xbb   :  { %52 = vst [vmem:[#allocation5 + $0x8] sm:$0xff] %v50_v16 }
  0xbc   :  { %112 = shalt.err (!%p109_p12)
}
  0xbd   :  { %s113_s1 = scalar_lea.hbm %s181_s2, 256 }
  0xbe   :  { %p114_p13 = scmp.ne.s32.totalorder %s181_s2, %s113_s1  ;;  %p117_p0 = scmp.lt.u32.totalorder %s113_s1, %s181_s2 }
  0xc0   :  { %p119_p1 = pnand %p117_p0, %p114_p13 }
  0xc2   :  { %122 = shalt.err (!%p119_p1)
}
  0xc3   :  { %64 = dma.vmem_to_hbm [thread:$0]  %s59_s25, 256, %s181_s2, [#allocation4], %s128_s19, %s128_s19, %s129_s20  }
  0xc4   :  { %125 = dma.done.wait [#allocation4], 256  }
  0xc5   :  { %126 = vsyncadd [#allocation4], 4294967040 }
  0xc6   :  { %68 = vsyncpa [#allocation3], 1 }
  0xc7   :  { %69 = vsyncpa [#allocation4], 1 }

</bundles_post_ra>
